<compile_context>
chip_gen: v7x
topology: tpu7x:2x2x1
jax: 0.10.0
libtpu: 0.0.40
codegen_flags: <defaults>
</compile_context>

<pallas_src>
import math
from functools import partial

import jax
import jax.numpy as jnp
from jax.experimental import pallas as pl
from jax.experimental.pallas import tpu as pltpu

H1, H2 = 256, 128


def _round_up(x, m):
    return ((x + m - 1) // m) * m


def critic_kernel(obs_ref, act_ref, w1_ref, b1_ref, w2_ref, b2_ref,
                  w3_ref, b3_ref, q_ref, x_ref, *, lane_dense):
    """Fused Critic forward for one batch tile (all operands VMEM-resident)."""
    obs_dim = obs_ref.shape[1]
    d_in = x_ref.shape[1]

    # Fused concat: pack [obs | action] into the f32 VMEM scratch (tiny copy).
    x_ref[:, :obs_dim] = obs_ref[...]
    x_ref[:, obs_dim:d_in] = act_ref[...]

    # fc1: single MXU dot (bf16 inputs, f32 accumulation), bias + ReLU on VPU.
    h1 = jnp.dot(x_ref[...].astype(w1_ref.dtype), w1_ref[...],
                 preferred_element_type=jnp.float32)
    h1 = jnp.maximum(h1 + b1_ref[...], 0.0)                        # (tb, 256) f32

    # fc2 + ReLU (cast back to bf16 only for the MXU input).
    h2 = jnp.dot(h1.astype(w2_ref.dtype), w2_ref[...],
                 preferred_element_type=jnp.float32)
    h2 = jnp.maximum(h2 + b2_ref[...], 0.0)                        # (tb, 128) f32

    # out: N=1 layer as VPU multiply + reduction (N=1 matmul wastes the MXU).
    qe = h2 * w3_ref[...]                                          # (tb, 128) f32
    if lane_dense:
        # Lane-dense store: transpose (XLU) then reduce along sublanes so the
        # per-tile result is a (1, tb) row -> dense stores, contiguous HBM.
        q_row = jnp.sum(jnp.transpose(qe, (1, 0)), axis=0, keepdims=True)
        q_row = q_row + b3_ref[...]                                # (1, tb)
        q_ref[...] = q_row.reshape(q_ref.shape).astype(q_ref.dtype)
    else:
        q_col = jnp.sum(qe, axis=-1, keepdims=True) + b3_ref[...]  # (tb, 1)
        q_ref[...] = q_col.astype(q_ref.dtype)


def critic_forward(obs, action, params, *, block_b=2048):
    """Fused Critic forward.

    params = (w1, b1, w2, b2, w3_row, b3); fc1/fc2 weights bf16 with shape
    (in_features, out_features); biases and w3_row f32.  Returns (B, 1) f32.
    """
    w1, b1, w2, b2, w3, b3 = params
    B, obs_dim = obs.shape
    act_dim = action.shape[1]
    d_in = obs_dim + act_dim
    assert w1.shape == (d_in, H1)

    # ---- batch tiling ------------------------------------------------------
    if B < 128:
        # Tiny batch: one grid step, simple (tb, 1) column output.
        tb = _round_up(B, 8)
        lane_dense = False
    else:
        # >= 2 grid steps when possible so the "parallel" axis can shard across
        # both v7x TensorCores; tb is a multiple of 128 so the lane-dense
        # output transpose stays tile-aligned.
        tb = min(block_b, _round_up(pl.cdiv(B, 2), 128))
        lane_dense = True
    n_tiles = pl.cdiv(B, tb)

    const2 = lambda i: (0, 0)   # weights: same block every step -> VMEM-resident

    in_specs = [
        pl.BlockSpec((tb, obs_dim), lambda i: (i, 0)),   # obs tile (f32)
        pl.BlockSpec((tb, act_dim), lambda i: (i, 0)),   # action tile (f32)
        pl.BlockSpec((d_in, H1), const2),                # W1 stacked (bf16)
        pl.BlockSpec((1, H1), const2),                   # b1 (f32)
        pl.BlockSpec((H1, H2), const2),                  # W2 (bf16)
        pl.BlockSpec((1, H2), const2),                   # b2 (f32)
        pl.BlockSpec((1, H2), const2),                   # w3 row (f32)
        pl.BlockSpec((1, 1), const2),                    # b3 (f32)
    ]

    if lane_dense:
        out_shape = jax.ShapeDtypeStruct((n_tiles, 1, tb), jnp.float32)
        out_specs = pl.BlockSpec((1, 1, tb), lambda i: (i, 0, 0))
    else:
        out_shape = jax.ShapeDtypeStruct((n_tiles * tb, 1), jnp.float32)
        out_specs = pl.BlockSpec((tb, 1), lambda i: (i, 0))

    flops = 2 * n_tiles * tb * (d_in * H1 + H1 * H2 + H2)
    bytes_accessed = (
        int(obs.size) * obs.dtype.itemsize
        + int(action.size) * action.dtype.itemsize
        + sum(int(p.size) * p.dtype.itemsize for p in params)
        + n_tiles * tb * 4)

    q = pl.pallas_call(
        partial(critic_kernel, lane_dense=lane_dense),
        out_shape=out_shape,
        grid=(n_tiles,),
        in_specs=in_specs,
        out_specs=out_specs,
        scratch_shapes=[pltpu.VMEM((tb, d_in), jnp.float32)],
        compiler_params=pltpu.CompilerParams(
            dimension_semantics=("parallel",)),
        cost_estimate=pl.CostEstimate(
            flops=flops, transcendentals=0, bytes_accessed=bytes_accessed),
    )(obs, action, w1, b1, w2, b2, w3, b3)

    q = q.reshape(-1, 1)
    return q[:B] if q.shape[0] != B else q


def init_critic_params(key, obs_dim, action_dim=5, weight_dtype=jnp.bfloat16):
    """Init mimicking torch.nn.Linear default U(-1/sqrt(fan_in), 1/sqrt(fan_in)).

    Weights stored (in_features, out_features).  fc1's weight is the single
    stacked (obs_dim+action_dim, 256) matrix (exactly equivalent to the torch
    concat).  MXU weights are bf16; the final-layer row and biases stay f32.
    """
    k1w, k1b, k2w, k2b, k3w, k3b = jax.random.split(key, 6)
    d_in = obs_dim + action_dim

    def u(k, shape, fan_in):
        bound = 1.0 / math.sqrt(fan_in)
        return jax.random.uniform(k, shape, jnp.float32, -bound, bound)

    w1 = u(k1w, (d_in, H1), d_in).astype(weight_dtype)   # stacked [obs; act] rows
    b1 = u(k1b, (1, H1), d_in)
    w2 = u(k2w, (H1, H2), H1).astype(weight_dtype)
    b2 = u(k2b, (1, H2), H1)
    w3_row = u(k3w, (1, H2), H2)                         # row form of (H2, 1)
    b3 = u(k3b, (1, 1), H2)
    return (w1, b1, w2, b2, w3_row, b3)


if __name__ == "__main__":
    obs_dim, action_dim = 32, 5

    key = jax.random.PRNGKey(0)
    k_data, k_param = jax.random.split(key)
    params = init_critic_params(k_param, obs_dim, action_dim)

    fwd = jax.jit(critic_forward)

    def reference(obs, action):
        # Pure-JAX reference with matching bf16 MXU inputs / f32 accumulation.
        w1, b1, w2, b2, w3, b3 = params
        f32 = jnp.float32
        x = jnp.concatenate([obs, action], axis=1)
        x = x.astype(jnp.bfloat16).astype(f32)
        h1 = jnp.maximum(x @ w1.astype(f32) + b1, 0.0)
        h1 = h1.astype(jnp.bfloat16).astype(f32)
        h2 = jnp.maximum(h1 @ w2.astype(f32) + b2, 0.0)
        return jnp.sum(h2 * w3, axis=-1, keepdims=True) + b3

    # batch=8 exercises the tiny single-tile column-store path; batch=256
    # exercises the lane-dense output and the 2-step "parallel" grid.
    for batch in (8, 256):
        ko, ka = jax.random.split(jax.random.fold_in(k_data, batch))
        obs = jax.random.normal(ko, (batch, obs_dim), jnp.float32)
        action = jax.random.normal(ka, (batch, action_dim), jnp.float32)

        q = fwd(obs, action, params)
        jax.block_until_ready(q)

        q_ref = reference(obs, action)
        assert q.shape == (batch, 1), q.shape
        assert jnp.allclose(q, q_ref, atol=2e-3, rtol=2e-3), (
            batch, float(jnp.max(jnp.abs(q - q_ref))))

    print("KERNEL_OK")
</pallas_src>

<mosaic_0001>
module attributes {stable_mosaic.version = 11 : i64} {
  func.func @critic_kernel(%arg0: i32, %arg1: memref<8x32xf32, #tpu.memory_space<vmem>>, %arg2: memref<8x5xf32, #tpu.memory_space<vmem>>, %arg3: memref<37x256xbf16, #tpu.memory_space<vmem>>, %arg4: memref<1x256xf32, #tpu.memory_space<vmem>>, %arg5: memref<256x128xbf16, #tpu.memory_space<vmem>>, %arg6: memref<1x128xf32, #tpu.memory_space<vmem>>, %arg7: memref<1x128xf32, #tpu.memory_space<vmem>>, %arg8: memref<1x1xf32, #tpu.memory_space<vmem>>, %arg9: memref<8x1xf32, #tpu.memory_space<vmem>>, %arg10: memref<8x37xf32, #tpu.memory_space<vmem>>) attributes {dimension_semantics = [#tpu.dimension_semantics<parallel>], iteration_bounds = array<i64: 1>, scalar_prefetch = 0 : i64, scratch_operands = 1 : i64, tpu.core_type = #tpu.core_type<tc>, window_params = [{transform_indices = @transform_0, window_bounds = array<i64: 8, 32>}, {transform_indices = @transform_1, window_bounds = array<i64: 8, 5>}, {pipeline_mode = #tpu.pipeline_mode<synchronous>, transform_indices = @transform_2, window_bounds = array<i64: 37, 256>}, {pipeline_mode = #tpu.pipeline_mode<synchronous>, transform_indices = @transform_3, window_bounds = array<i64: 1, 256>}, {pipeline_mode = #tpu.pipeline_mode<synchronous>, transform_indices = @transform_4, window_bounds = array<i64: 256, 128>}, {pipeline_mode = #tpu.pipeline_mode<synchronous>, transform_indices = @transform_5, window_bounds = array<i64: 1, 128>}, {pipeline_mode = #tpu.pipeline_mode<synchronous>, transform_indices = @transform_6, window_bounds = array<i64: 1, 128>}, {pipeline_mode = #tpu.pipeline_mode<synchronous>, transform_indices = @transform_7, window_bounds = array<i64: 1, 1>}, {transform_indices = @transform_8, window_bounds = array<i64: 8, 1>}]} {
    %c0 = arith.constant 0 : index
    %c0_0 = arith.constant 0 : index
    %0 = vector.load %arg1[%c0, %c0_0] : memref<8x32xf32, #tpu.memory_space<vmem>>, vector<8x32xf32>
    %c0_1 = arith.constant 0 : index
    %c0_2 = arith.constant 0 : index
    %1 = vector.load %arg10[%c0_1, %c0_2] : memref<8x37xf32, #tpu.memory_space<vmem>>, vector<8x32xf32>
    tpu.vector_store %arg10[%c0_1, %c0_2], %0 {strides = array<i32>} : memref<8x37xf32, #tpu.memory_space<vmem>>, vector<8x32xf32>,
    %c0_3 = arith.constant 0 : index
    %c0_4 = arith.constant 0 : index
    %2 = vector.load %arg2[%c0_3, %c0_4] : memref<8x5xf32, #tpu.memory_space<vmem>>, vector<8x5xf32>
    %c0_5 = arith.constant 0 : index
    %c32 = arith.constant 32 : index
    %3 = vector.load %arg10[%c0_5, %c32] : memref<8x37xf32, #tpu.memory_space<vmem>>, vector<8x5xf32>
    tpu.vector_store %arg10[%c0_5, %c32], %2 {strides = array<i32>} : memref<8x37xf32, #tpu.memory_space<vmem>>, vector<8x5xf32>,
    %c0_6 = arith.constant 0 : index
    %c0_7 = arith.constant 0 : index
    %4 = vector.load %arg10[%c0_6, %c0_7] : memref<8x37xf32, #tpu.memory_space<vmem>>, vector<8x37xf32>
    %5 = arith.truncf %4 : vector<8x37xf32> to vector<8x37xbf16>
    %c0_8 = arith.constant 0 : index
    %c0_9 = arith.constant 0 : index
    %6 = vector.load %arg3[%c0_8, %c0_9] : memref<37x256xbf16, #tpu.memory_space<vmem>>, vector<37x256xbf16>
    %cst = arith.constant dense<0.000000e+00> : vector<8x256xf32>
    %7 = tpu.matmul %5, %6, %cst {dimension_numbers = #tpu.dot_dimension_numbers<[1], [0], [0], [1], [0, 0, 1, 1], [], []>} : vector<8x37xbf16>, vector<37x256xbf16>, vector<8x256xf32> -> vector<8x256xf32>
    %c0_10 = arith.constant 0 : index
    %c0_11 = arith.constant 0 : index
    %8 = vector.load %arg4[%c0_10, %c0_11] : memref<1x256xf32, #tpu.memory_space<vmem>>, vector<1x256xf32>
    %9 = vector.broadcast %8 : vector<1x256xf32> to vector<8x256xf32>
    %10 = arith.addf %7, %9 : vector<8x256xf32>
    %cst_12 = arith.constant 0.000000e+00 : f32
    %11 = vector.broadcast %cst_12 : f32 to vector<8x256xf32>
    %12 = arith.maximumf %10, %11 : vector<8x256xf32>
    %13 = arith.truncf %12 : vector<8x256xf32> to vector<8x256xbf16>
    %c0_13 = arith.constant 0 : index
    %c0_14 = arith.constant 0 : index
    %14 = vector.load %arg5[%c0_13, %c0_14] : memref<256x128xbf16, #tpu.memory_space<vmem>>, vector<256x128xbf16>
    %cst_15 = arith.constant dense<0.000000e+00> : vector<8x128xf32>
    %15 = tpu.matmul %13, %14, %cst_15 {dimension_numbers = #tpu.dot_dimension_numbers<[1], [0], [0], [1], [0, 0, 1, 1], [], []>} : vector<8x256xbf16>, vector<256x128xbf16>, vector<8x128xf32> -> vector<8x128xf32>
    %c0_16 = arith.constant 0 : index
    %c0_17 = arith.constant 0 : index
    %16 = vector.load %arg6[%c0_16, %c0_17] : memref<1x128xf32, #tpu.memory_space<vmem>>, vector<1x128xf32>
    %17 = vector.broadcast %16 : vector<1x128xf32> to vector<8x128xf32>
    %18 = arith.addf %15, %17 : vector<8x128xf32>
    %cst_18 = arith.constant 0.000000e+00 : f32
    %19 = vector.broadcast %cst_18 : f32 to vector<8x128xf32>
    %20 = arith.maximumf %18, %19 : vector<8x128xf32>
    %c0_19 = arith.constant 0 : index
    %c0_20 = arith.constant 0 : index
    %21 = vector.load %arg7[%c0_19, %c0_20] : memref<1x128xf32, #tpu.memory_space<vmem>>, vector<1x128xf32>
    %22 = vector.broadcast %21 : vector<1x128xf32> to vector<8x128xf32>
    %23 = arith.mulf %20, %22 : vector<8x128xf32>
    %cst_21 = arith.constant dense<0.000000e+00> : vector<8xf32>
    %24 = vector.multi_reduction <add>, %23, %cst_21 [1] : vector<8x128xf32> to vector<8xf32>
    %25 = vector.shape_cast %24 : vector<8xf32> to vector<8x1xf32>
    %c0_22 = arith.constant 0 : index
    %c0_23 = arith.constant 0 : index
    %26 = vector.load %arg8[%c0_22, %c0_23] : memref<1x1xf32, #tpu.memory_space<vmem>>, vector<1x1xf32>
    %27 = vector.broadcast %26 : vector<1x1xf32> to vector<8x1xf32>
    %28 = arith.addf %25, %27 : vector<8x1xf32>
    %c0_24 = arith.constant 0 : index
    %c0_25 = arith.constant 0 : index
    %29 = vector.load %arg9[%c0_24, %c0_25] : memref<8x1xf32, #tpu.memory_space<vmem>>, vector<8x1xf32>
    tpu.vector_store %arg9[%c0_24, %c0_25], %28 {strides = array<i32>} : memref<8x1xf32, #tpu.memory_space<vmem>>, vector<8x1xf32>,
    return
  }
  func.func @transform_0(%arg0: i32) -> (i32, i32) {
    %c0_i32 = arith.constant 0 : i32
    %c0_i32_0 = arith.constant 0 : i32
    return %arg0, %c0_i32 : i32, i32
  }
  func.func @transform_1(%arg0: i32) -> (i32, i32) {
    %c0_i32 = arith.constant 0 : i32
    %c0_i32_0 = arith.constant 0 : i32
    return %arg0, %c0_i32 : i32, i32
  }
  func.func @transform_2(%arg0: i32) -> (i32, i32) {
    %c0_i32 = arith.constant 0 : i32
    %c0_i32_0 = arith.constant 0 : i32
    %c0_i32_1 = arith.constant 0 : i32
    return %c0_i32, %c0_i32_0 : i32, i32
  }
  func.func @transform_3(%arg0: i32) -> (i32, i32) {
    %c0_i32 = arith.constant 0 : i32
    %c0_i32_0 = arith.constant 0 : i32
    %c0_i32_1 = arith.constant 0 : i32
    return %c0_i32, %c0_i32_0 : i32, i32
  }
  func.func @transform_4(%arg0: i32) -> (i32, i32) {
    %c0_i32 = arith.constant 0 : i32
    %c0_i32_0 = arith.constant 0 : i32
    %c0_i32_1 = arith.constant 0 : i32
    return %c0_i32, %c0_i32_0 : i32, i32
  }
  func.func @transform_5(%arg0: i32) -> (i32, i32) {
    %c0_i32 = arith.constant 0 : i32
    %c0_i32_0 = arith.constant 0 : i32
    %c0_i32_1 = arith.constant 0 : i32
    return %c0_i32, %c0_i32_0 : i32, i32
  }
  func.func @transform_6(%arg0: i32) -> (i32, i32) {
    %c0_i32 = arith.constant 0 : i32
    %c0_i32_0 = arith.constant 0 : i32
    %c0_i32_1 = arith.constant 0 : i32
    return %c0_i32, %c0_i32_0 : i32, i32
  }
  func.func @transform_7(%arg0: i32) -> (i32, i32) {
    %c0_i32 = arith.constant 0 : i32
    %c0_i32_0 = arith.constant 0 : i32
    %c0_i32_1 = arith.constant 0 : i32
    return %c0_i32, %c0_i32_0 : i32, i32
  }
  func.func @transform_8(%arg0: i32) -> (i32, i32) {
    %c0_i32 = arith.constant 0 : i32
    %c0_i32_0 = arith.constant 0 : i32
    return %arg0, %c0_i32 : i32, i32
  }
}

</mosaic_0001>

<bundles_post_ra>
// kernel: critic_forward.1
= control target key start
LH: loop header
LB: loop body
LE: loop exit
PB: predicated region body
PF: predicated region fallthrough
CT: control target
= control target key end

     0   :  { %s695_s0 = inlined_call_operand.hbm [shape: f32[8,32], index: 0, kind: input, shape index: {}]   ;;  %s696_s1 = inlined_call_operand.hbm [shape: f32[8,5], index: 1, kind: input, shape index: {}]   ;;  %s697_s2 = inlined_call_operand.hbm [shape: bf16[37,256], index: 2, kind: input, shape index: {}]   ;;  %s698_s3 = inlined_call_operand.vmem [shape: f32[1,256], index: 3, kind: input, shape index: {}]   ;;  %s699_s4 = inlined_call_operand.hbm [shape: bf16[256,128], index: 4, kind: input, shape index: {}]   ;;  %s700_s5 = inlined_call_operand.vmem [shape: f32[1,128], index: 5, kind: input, shape index: {}]   ;;  %s701_s6 = inlined_call_operand.vmem [shape: f32[1,128], index: 6, kind: input, shape index: {}]   ;;  %s702_s7 = inlined_call_operand.<no memory space> [shape: f32[1,1], index: 7, kind: input, shape index: {}]   ;;  %s703_s8 = inlined_call_operand.vmem [shape: f32[8,1], index: 8, kind: output, shape index: {}]  }
   0x1   :  { %v13_v0 = vstv %s702_s7 }
   0x2   :  { %14 = vst [vmem:[#allocation3] sm:$0x1] %v13_v0 }
   0x3   :  { %15 = vsyncpa [#allocation5], 0 }
   0x4   :  { %16 = vsyncpa [#allocation7], 0 }
   0x5   :  { %17 = vsyncpa [#allocation10], 0  ;;  %s576_s29 = smov [#allocation6]   ;;  %s577_s9 = smov [#allocation4]  }
   0x6   :  { %s34_s30 = sshll.u32 %s576_s29, 4  ;;  %s24_s10 = sshll.u32 %s577_s9, 4  ;;  %s35_s30 = int_to_ptr.vmem [resolvable:$true] %s34_s30  ;;  %s25_s10 = int_to_ptr.vmem [resolvable:$true] %s24_s10 }
   0x7   :  { %s482_s13 = scalar_lea.hbm %s696_s1, 128 }
   0x8   :  { %p483_p0 = scmp.ne.s32.totalorder %s696_s1, %s482_s13  ;;  %p486_p1 = scmp.lt.u32.totalorder %s482_s13, %s696_s1 }
   0xa   :  { %p488_p2 = pnand %p486_p1, %p483_p0 }
   0xc   :  { %491 = shalt.err (!%p488_p2)
}
   0xd   :  { %s492_s17 = scalar_lea.vmem %s35_s30, 128  ;;  %p497_p4 = scmp.lt.s32.totalorder %s35_s30, %s35_s30 }
   0xe   :  { %p493_p3 = scmp.ne.s32.totalorder %s35_s30, %s492_s17  ;;  %p498_p5 = scmp.lt.s32.totalorder %s492_s17, %s492_s17 }
  0x10   :  { %p499_p6 = por %p498_p5, %p497_p4 }
  0x12   :  { %p500_p7 = pnand %p499_p6, %p493_p3 }
  0x14   :  { %503 = shalt.err (!%p500_p7)
}
  0x15   :  { %37 = dma.hbm_to_vmem [thread:$0]  %s696_s1, 128, %s35_s30, [#allocation7]  }
  0x16   :  { %s504_s22 = scalar_lea.hbm %s695_s0, 128 }
  0x17   :  { %p505_p8 = scmp.ne.s32.totalorder %s695_s0, %s504_s22  ;;  %p508_p9 = scmp.lt.u32.totalorder %s504_s22, %s695_s0 }
  0x19   :  { %p510_p10 = pnand %p508_p9, %p505_p8 }
  0x1b   :  { %513 = shalt.err (!%p510_p10)
}
  0x1c   :  { %s514_s27 = scalar_lea.vmem %s25_s10, 128  ;;  %p519_p12 = scmp.lt.s32.totalorder %s25_s10, %s25_s10 }
  0x1d   :  { %p515_p11 = scmp.ne.s32.totalorder %s25_s10, %s514_s27  ;;  %p520_p13 = scmp.lt.s32.totalorder %s514_s27, %s514_s27 }
  0x1f   :  { %p521_p0 = por %p520_p13, %p519_p12 }
  0x21   :  { %p522_p1 = pnand %p521_p0, %p515_p11 }
  0x23   :  { %525 = shalt.err (!%p522_p1)
}
  0x24   :  { %27 = dma.hbm_to_vmem [thread:$0]  %s695_s0, 128, %s25_s10, [#allocation5]  }
  0x25   :  { %s578_s29 = smov [#allocation8]   ;;  %s526_s12 = scalar_lea.hbm %s697_s2, 640 }
  0x26   :  { %s43_s30 = sshll.u32 %s578_s29, 4  ;;  %p527_p2 = scmp.ne.s32.totalorder %s697_s2, %s526_s12  ;;  %s44_s30 = int_to_ptr.vmem [resolvable:$true] %s43_s30 }
  0x27   :  { %p530_p3 = scmp.lt.u32.totalorder %s526_s12, %s697_s2 }
  0x29   :  { %p532_p4 = pnand %p530_p3, %p527_p2 }
  0x2b   :  { %535 = shalt.err (!%p532_p4)
}
  0x2c   :  { %s536_s7 = scalar_lea.vmem %s44_s30, 640  ;;  %p541_p6 = scmp.lt.s32.totalorder %s44_s30, %s44_s30 }
  0x2d   :  { %p537_p5 = scmp.ne.s32.totalorder %s44_s30, %s536_s7  ;;  %p542_p7 = scmp.lt.s32.totalorder %s536_s7, %s536_s7 }
  0x2f   :  { %p543_p8 = por %p542_p7, %p541_p6 }
  0x31   :  { %p544_p9 = pnand %p543_p8, %p537_p5 }
  0x33   :  { %547 = shalt.err (!%p544_p9)
}
  0x34   :  { %s579_s0 = smov 128   ;;  %s580_s10 = smov 8  }
  0x35   :  { %49 = dma.hbm_to_vmem [thread:$0]  %s697_s2, 640, %s44_s30, [#allocation7], %s579_s0, %s579_s0, %s580_s10  }
  0x36   :  { %s581_s19 = smov [#allocation9]   ;;  %s548_s23 = scalar_lea.hbm %s699_s4, 2048 }
  0x37   :  { %s57_s20 = sshll.u32 %s581_s19, 4  ;;  %p549_p10 = scmp.ne.s32.totalorder %s699_s4, %s548_s23  ;;  %s58_s20 = int_to_ptr.vmem [resolvable:$true] %s57_s20 }
  0x38   :  { %p552_p11 = scmp.lt.u32.totalorder %s548_s23, %s699_s4 }
  0x3a   :  { %p554_p12 = pnand %p552_p11, %p549_p10 }
  0x3c   :  { %557 = shalt.err (!%p554_p12)
}
  0x3d   :  { %s558_s1 = scalar_lea.vmem %s58_s20, 2048  ;;  %p563_p0 = scmp.lt.s32.totalorder %s58_s20, %s58_s20 }
  0x3e   :  { %p559_p13 = scmp.ne.s32.totalorder %s58_s20, %s558_s1  ;;  %p564_p1 = scmp.lt.s32.totalorder %s558_s1, %s558_s1 }
  0x40   :  { %p565_p2 = por %p564_p1, %p563_p0 }
  0x42   :  { %p566_p3 = pnand %p565_p2, %p559_p13 }
  0x44   :  { %569 = shalt.err (!%p566_p3)
}
  0x45   :  { %s582_s2 = smov 64   ;;  %s583_s28 = smov 4  }
  0x46   :  { %63 = dma.hbm_to_vmem [thread:$0]  %s699_s4, 2048, %s58_s20, [#allocation10], %s582_s2, %s582_s2, %s583_s28  }
  0x47   :  { %570 = dma.done.wait [#allocation5], 128  }
  0x48   :  { %571 = vsyncadd [#allocation5], 4294967168 }
  0x49   :  { %572 = dma.done.wait [#allocation7], 768  }
  0x4a   :  { %573 = vsyncadd [#allocation7], 4294966528 }
  0x4b   :  { %574 = dma.done.wait [#allocation10], 2048  }
  0x4c   :  { %575 = vsyncadd [#allocation10], 4294965248  ;;  %v584_v1 = vmov 0   ;;  %vm141_vm0 = vcmask 1041408   ;;  %vm84_vm1 = vcmask 261120   ;;  %vm142_vm2 = vcmask 1042432  }
  0x4d   :  { %183 = vmatprep.mubr.bf16.mxu0 %v584_v1  ;;  %v585_v2 = vmov 65535   ;;  %v86_v4 = vld [vmem:[#allocation6] sm:$0xff]  ;;  %s586_s9 = smov 32   ;;  %v458_v5 = vld [vmem:[#allocation8 + $0x4] ss:$8 sps:$4 sm:$0xff]   ;;  %v83_v7 = vld [vmem:[#allocation4] sm:$0xff]  ;;  %v102_v35 = vlaneseq }
  0x4e   :  { %v143_v3 = vsel %vm141_vm0, 4294967295, %v585_v2  ;;  %88 = vrot.lane.b32.xlu0 %v86_v4, %s586_s9  ;;  %v460_v6 = vld [vmem:[#allocation8] ss:$8 sps:$4 sm:$0xff]   ;;  %85 = vst.msk [vmem:[#allocation2] sm:$0xff] %vm84_vm1, %v83_v7  ;;  %v461_v8 = vld [vmem:[#allocation8 + $0x14] ss:$8 sps:$4 sm:$0xff]   ;;  %151 = vmatprep.subr.bf16.mxu0 %v458_v5 }
  0x4f   :  { %v144_v9 = vsel %vm142_vm2, %v143_v3, 0  ;;  %v463_v10 = vld [vmem:[#allocation8 + $0x10] ss:$8 sps:$4 sm:$0xff]   ;;  %v99_v11 = vld [vmem:[#allocation8 + $0x20] sm:$0x77]  ;;  %152 = vmatpush1.bf16.msra.mxu0 %v460_v6  ;;  %v466_v14 = vld [vmem:[#allocation9 + $0x40] sm:$0xff]  }
  0x50   :  { %v404_v12 = vcombine.high %v99_v11, %v99_v11  ;;  %v403_v13 = vcombine.low %v99_v11, %v99_v11  ;;  %153 = vmatprep.subr.bf16.mxu0 %v461_v8  ;;  %v467_v15 = vld [vmem:[#allocation9] sm:$0xff]   ;;  %425 = vmatprep.subr.bf16.mxu1 %v466_v14  ;;  %v468_v17 = vld [vmem:[#allocation9 + $0x48] sm:$0xff]   ;;  %v470_v20 = vld [vmem:[#allocation9 + $0x50] sm:$0xff]   ;;  %vm91_vm3 = vcmask 302336   ;;  %vm137_vm4 = vcmask 302080  }
  0x51   :  { %426 = vmatpush3.bf16.msra.mxu1 %v467_v15  ;;  %v469_v18 = vld [vmem:[#allocation9 + $0x8] sm:$0xff]   ;;  %v471_v21 = vld [vmem:[#allocation9 + $0x10] sm:$0xff]   ;;  %v472_v22 = vld [vmem:[#allocation9 + $0x58] sm:$0xff]   ;;  %v103_v36 = vshrl.u32 %v102_v35, 7  ;;  %vm390_vm5 = vcmask 7168  }
  0x52   :  { %v149_v16 = vand.u32 %v404_v12, %v144_v9  ;;  %v146_v19 = vand.u32 %v403_v13, %v144_v9  ;;  %427 = vmatprep.subr.bf16.mxu1 %v468_v17  ;;  %v473_v23 = vld [vmem:[#allocation9 + $0x18] sm:$0xff]   ;;  %v474_v24 = vld [vmem:[#allocation9 + $0x60] sm:$0xff]   ;;  %v476_v26 = vld [vmem:[#allocation9 + $0x68] sm:$0xff]  }
  0x53   :  { %154 = vmatpush1.bf16.msra.mxu0 %v463_v10  ;;  %v475_v25 = vld [vmem:[#allocation9 + $0x20] sm:$0xff]   ;;  %v477_v27 = vld [vmem:[#allocation9 + $0x28] sm:$0xff]   ;;  %v478_v31 = vld [vmem:[#allocation9 + $0x70] sm:$0xff]   ;;  %v104_v37 = vsub.s32 0, %v103_v36  ;;  %v108_v39 = vsub.s32 1, %v103_v36 }
  0x54   :  { %155 = vmatprep.subr.bf16.mxu0 %v149_v16  ;;  %v479_v32 = vld [vmem:[#allocation9 + $0x30] sm:$0xff]   ;;  %v480_v33 = vld [vmem:[#allocation9 + $0x78] sm:$0xff]   ;;  %v424_v62 = vld [vmem:[#allocation3] ss:$0 sm:$0xff] }
  0x55   :  { %428 = vmatpush3.bf16.msra.mxu1 %v469_v18  ;;  %v481_v34 = vld [vmem:[#allocation9 + $0x38] sm:$0xff]  }
  0x56   :  { %429 = vmatprep.subr.bf16.mxu1 %v470_v20  ;;  %v100_v38 = vld [vmem:[%s698_s3] sm:$0x3] }
  0x57   :  { %156 = vmatpush1.bf16.msra.mxu0 %v146_v19  ;;  %v105_v40 = vrot.slane %v100_v38, %v104_v37  ;;  %v109_v41 = vrot.slane %v100_v38, %v108_v39  ;;  %v406_v53 = vld [vmem:[%s700_s5] ss:$0 sm:$0xff] }
  0x58   :  { %v423_v59 = vld [vmem:[%s701_s6] ss:$0 sm:$0xff] }
  0x59   :  { %430 = vmatpush3.bf16.msra.mxu1 %v471_v21 }
  0x5a   :  { %431 = vmatprep.subr.bf16.mxu1 %v472_v22 }
  0x5d   :  { %432 = vmatpush3.bf16.msra.mxu1 %v473_v23 }
  0x5e   :  { %433 = vmatprep.subr.bf16.mxu1 %v474_v24 }
  0x61   :  { %434 = vmatpush3.bf16.msra.mxu1 %v475_v25 }
  0x62   :  { %435 = vmatprep.subr.bf16.mxu1 %v476_v26 }
  0x65   :  { %436 = vmatpush3.bf16.msra.mxu1 %v477_v27 }
  0x66   :  { %437 = vmatprep.subr.bf16.mxu1 %v478_v31 }
  0x69   :  { %438 = vmatpush3.bf16.msra.mxu1 %v479_v32 }
  0x6a   :  { %439 = vmatprep.subr.bf16.mxu1 %v480_v33 }
  0x6d   :  { %440 = vmatpush3.bf16.msra.mxu1 %v481_v34 }
  0xc0   :  { %v89_v28 = vpop.permute.xlu0 %88 }
  0xc1   :  { %92 = vst.msk [vmem:[#allocation2] sm:$0xff] %vm91_vm3, %v89_v28 }
  0xc8   :  { %v93_v29 = vld [vmem:[#allocation2] sm:$0xff] }
  0xc9   :  { %v94_v30 = vpack.c.bf16 %v93_v29, %v93_v29 }
  0xcb   :  { %405 = vmatmul.mubr.msk.bf16.vlgmr.msra.gmra.mrb[0].mxu0 %vm137_vm4, %v94_v30 }
 0x19e   :  { %v185_v42 = vpop.f32.mrb[0].mxu0 }
 0x19f   :  { %v186_v43 = vadd.f32 %v185_v42, %v105_v40  ;;  %v187_v44 = vpop.f32.mrb[1].mxu0 }
 0x1a0   :  { %v188_v45 = vadd.f32 %v187_v44, %v109_v41  ;;  %v189_v46 = vpop.f32.mrb[2].mxu0 }
 0x1a1   :  { %v192_v47 = vmax.f32 %v186_v43, 0.0  ;;  %v190_v48 = vpop.f32.mrb[3].mxu0 }
 0x1a2   :  { %v193_v49 = vmax.f32 %v188_v45, 0.0 }
 0x1a3   :  { %v194_v51 = vpack.c.bf16 %v192_v47, %v192_v47 }
 0x1a4   :  { %v195_v50 = vpack.c.bf16 %v193_v49, %v193_v49 }
 0x1a6   :  { %363 = vmatprep.mubr.bf16.mxu1 %v195_v50 }
 0x1a7   :  { %364 = vmatmul.mubr.bf16.vlgmr.msra.gmra.mrb[0].mxu1 %v194_v51 }
 0x27a   :  { %v441_v52 = vpop.f32.mrb[0].mxu1 }
 0x27b   :  { %v442_v54 = vpop.f32.mrb[1].mxu1 }
 0x27c   :  { %v443_v55 = vadd.f32 %v442_v54, %v441_v52  ;;  %v444_v56 = vpop.f32.mrb[2].mxu1 }
 0x27d   :  { %v445_v57 = vpop.f32.mrb[3].mxu1 }
 0x27e   :  { %v366_v58 = vadd.f32 %v443_v55, %v406_v53 }
 0x280   :  { %v371_v60 = vmax.f32 %v366_v58, 0.0 }
 0x282   :  { %v379_v61 = vmul.f32 %v423_v59, %v371_v60 }
 0x284   :  { %380 = vadd.xlane.f32.xlu0 %v379_v61 }
 0x311   :  { %v381_v63 = vpop.xlane.xlu0 %380 }
 0x312   :  { %v389_v0 = vadd.f32 %v424_v62, %v381_v63 }
 0x314   :  { %391 = vst.msk [vmem:[%s703_s8] sm:$0xff] %vm390_vm5, %v389_v0 }
 0x315   :  { %396 = vsyncpa [#allocation5], 1 }
 0x316   :  { %397 = vsyncpa [#allocation7], 1 }
 0x317   :  { %398 = vsyncpa [#allocation10], 1 }

</bundles_post_ra>
